<compile_context>
chip_gen: v7x
topology: tpu7x:2x2x1
jax: 0.10.0
libtpu: 0.0.40
codegen_flags: <defaults>
</compile_context>

<pallas_src>
import math

import jax
import jax.numpy as jnp
from jax.experimental import pallas as pl
from jax.experimental.pallas import tpu as pltpu


# ---------------------------------------------------------------------------
# Kernel
# ---------------------------------------------------------------------------
def _make_mha_kernel(head_num, head_dim, return_weights):
    def kernel(q_ref, k_ref, v_ref, mask_ref,
               wq_ref, bq_ref, wk_ref, wv_ref, bv_ref, *rest):
        if return_weights:
            out_ref, attn_ref, q_s, k_s, v_s = rest
        else:
            out_ref, q_s, k_s, v_s = rest
            attn_ref = None

        Bb, S, D_in = q_ref.shape
        HD = head_num * head_dim
        inv_sqrt_dk = 1.0 / math.sqrt(head_dim)

        # ---- projections: one big (Bb*S, D_in) @ (D_in, HD) MXU matmul each ----
        x_q = q_ref[...].reshape(Bb * S, D_in)
        x_k = k_ref[...].reshape(Bb * S, D_in)
        x_v = v_ref[...].reshape(Bb * S, D_in)

        q_all = jnp.dot(x_q, wq_ref[...], preferred_element_type=jnp.float32) + bq_ref[...]
        k_all = jnp.dot(x_k, wk_ref[...], preferred_element_type=jnp.float32)   # W_K: no bias
        v_all = jnp.dot(x_v, wv_ref[...], preferred_element_type=jnp.float32) + bv_ref[...]

        # Park the projections in VMEM scratch so the head loop re-loads small
        # slices instead of holding three (Bb, S, HD) values live in vregs.
        # 1/sqrt(d_k) is folded into q here (S*HD multiplies, once).
        q_s[...] = ((q_all * inv_sqrt_dk).reshape(Bb, S, HD)).astype(q_s.dtype)
        k_s[...] = k_all.reshape(Bb, S, HD).astype(k_s.dtype)
        v_s[...] = v_all.reshape(Bb, S, HD).astype(v_s.dtype)

        m = mask_ref[...]                      # (Bb, 1, S) key mask, broadcast over queries

        # ---- per-head scaled-dot-product attention, batched over Bb ----
        # Static loop: every iteration only reads refs and writes refs, so no value
        # is live across iterations (flat vreg pressure even for large head counts).
        # TODO(synk): switch to lax.fori_loop with pl.ds lane slices for very large
        # head counts once dynamic non-128-aligned lane offsets lower cleanly.
        for h in range(head_num):
            sl = slice(h * head_dim, (h + 1) * head_dim)
            qh = q_s[:, :, sl]                 # (Bb, S, d)
            kh = k_s[:, :, sl]                 # (Bb, S, d)
            vh = v_s[:, :, sl]                 # (Bb, S, d)

            # Q @ K^T without materializing a transpose (contract the last dims).
            scores = jax.lax.dot_general(
                qh, kh, dimension_numbers=(((2,), (2,)), ((0,), (0,))),
                preferred_element_type=jnp.float32)          # (Bb, S, S)

            # Matches the torch module: exp (no max-subtraction), key mask, normalize.
            scores = jnp.exp(scores) * m
            denom = jnp.sum(scores, axis=-1, keepdims=True) + 1e-8
            attn_w = scores * pl.reciprocal(denom, approx=True)   # EUP, not VALU divide

            ctx = jax.lax.dot_general(
                attn_w.astype(vh.dtype), vh,
                dimension_numbers=(((2,), (1,)), ((0,), (0,))),
                preferred_element_type=jnp.float32)          # (Bb, S, d)

            out_ref[:, :, sl] = ctx.astype(out_ref.dtype)    # direct store, no ctx scratch
            if return_weights:
                attn_ref[:, h, :, :] = attn_w.astype(attn_ref.dtype)

    return kernel


# ---------------------------------------------------------------------------
# Sizing heuristics (per-generation VMEM budget)
# ---------------------------------------------------------------------------
def _vmem_capacity_bytes():
    try:
        info = pltpu.get_tpu_info()
        cap = getattr(info, "vmem_capacity_bytes", None)
        if cap:
            return int(cap)
    except Exception:
        pass
    return 64 << 20       # conservative fallback (v7x per-TensorCore VMEM)


def _residency_bytes(bb, S, D_in, HD, head_num, with_attn, in_bytes, attn_bytes):
    """Rough per-step VMEM residency (double-buffered pipelined blocks + scratch)."""
    dbl = 2
    qkv_in = 3 * bb * S * D_in * in_bytes * dbl
    mask_b = bb * S * 4 * dbl
    weights = (3 * D_in * HD * in_bytes + 2 * HD * 4) * dbl
    ctx_out = bb * S * HD * 4 * dbl
    attn_out = bb * head_num * S * S * attn_bytes * dbl if with_attn else 0
    scratch = 3 * bb * S * HD * in_bytes
    return qkv_in + mask_b + weights + ctx_out + attn_out + scratch


def _pick_batch_block(B, S, D_in, HD, head_num, with_attn, in_bytes, attn_bytes, vmem_cap):
    # Bigger blocks amortize the ~0.35us/step overhead and fill the MXU rows.
    # 128 MiB VMEM parts (v5e/v6e) can afford ~512 rows; 64 MiB (v7x) stays at 256.
    rows_target = 512 if vmem_cap >= (96 << 20) else 256
    budget = int(vmem_cap * 0.6)

    bb = max(1, min(B, -(-rows_target // S)))
    while bb > 1 and _residency_bytes(bb, S, D_in, HD, head_num, with_attn,
                                      in_bytes, attn_bytes) > budget:
        bb -= 1
    # Keep >= 2 grid steps so the "parallel" axis actually feeds both v7x TensorCores.
    while bb > 1 and -(-B // bb) < 2:
        bb -= 1
    return bb


# ---------------------------------------------------------------------------
# Wrapper
# ---------------------------------------------------------------------------
def multi_head_attention(Q, K, V, mask, wq, bq, wk, wv, bv, *,
                         head_num, head_dim, residual=False, mxu_bf16=False,
                         return_weights=True, attn_dtype=jnp.float32,
                         batch_block=None):
    """Pallas implementation of MultiHeadAttention.forward.

    Q, K, V : (B, S, D_in) float32
    mask    : (B, S) key mask (1 = keep, 0 = masked) or None
    returns : (output (B, S, head_num*head_dim),
               attn_w (B, head_num, S, S) or None if return_weights=False)
    """
    B, S, D_in = Q.shape
    HD = head_num * head_dim

    if mask is None:
        mask = jnp.ones((B, S), jnp.float32)
    mask = mask.astype(jnp.float32)

    # Pre-cast once in the wrapper (halves weight/input DMA, removes per-step casts).
    in_dtype = jnp.bfloat16 if mxu_bf16 else jnp.float32
    Qk, Kk, Vk = Q.astype(in_dtype), K.astype(in_dtype), V.astype(in_dtype)
    wq_c, wk_c, wv_c = wq.astype(in_dtype), wk.astype(in_dtype), wv.astype(in_dtype)
    bq_c = bq.astype(jnp.float32).reshape(1, HD)
    bv_c = bv.astype(jnp.float32).reshape(1, HD)

    in_bytes = jnp.dtype(in_dtype).itemsize
    attn_bytes = jnp.dtype(attn_dtype).itemsize
    vmem_cap = _vmem_capacity_bytes()

    if batch_block is None:
        Bb = _pick_batch_block(B, S, D_in, HD, head_num, return_weights,
                               in_bytes, attn_bytes, vmem_cap)
    else:
        Bb = max(1, min(B, batch_block))

    residency = _residency_bytes(Bb, S, D_in, HD, head_num, return_weights,
                                 in_bytes, attn_bytes)
    vmem_limit = int(min(vmem_cap * 3 // 4, max(2 * residency, 32 << 20)))

    B_pad = -(-B // Bb) * Bb
    if B_pad != B:
        pad3 = ((0, B_pad - B), (0, 0), (0, 0))
        Qk, Kk, Vk = jnp.pad(Qk, pad3), jnp.pad(Kk, pad3), jnp.pad(Vk, pad3)
        mask = jnp.pad(mask, ((0, B_pad - B), (0, 0)))
    mask3 = mask.reshape(B_pad, 1, S)

    kernel = _make_mha_kernel(head_num, head_dim, return_weights)

    out_shapes = [jax.ShapeDtypeStruct((B_pad, S, HD), jnp.float32)]
    out_specs = [pl.BlockSpec((Bb, S, HD), lambda b: (b, 0, 0))]
    if return_weights:
        out_shapes.append(jax.ShapeDtypeStruct((B_pad, head_num, S, S), attn_dtype))
        out_specs.append(pl.BlockSpec((Bb, head_num, S, S), lambda b: (b, 0, 0, 0)))

    # NOTE: weight/bias blocks have constant index_maps, so Pallas does not re-DMA
    # them between grid steps.
    grid_spec = pltpu.PrefetchScalarGridSpec(
        num_scalar_prefetch=0,
        grid=(B_pad // Bb,),
        in_specs=[
            pl.BlockSpec((Bb, S, D_in), lambda b: (b, 0, 0)),   # Q
            pl.BlockSpec((Bb, S, D_in), lambda b: (b, 0, 0)),   # K
            pl.BlockSpec((Bb, S, D_in), lambda b: (b, 0, 0)),   # V
            pl.BlockSpec((Bb, 1, S), lambda b: (b, 0, 0)),      # key mask
            pl.BlockSpec((D_in, HD), lambda b: (0, 0)),         # W_Q
            pl.BlockSpec((1, HD), lambda b: (0, 0)),            # b_Q
            pl.BlockSpec((D_in, HD), lambda b: (0, 0)),         # W_K (no bias)
            pl.BlockSpec((D_in, HD), lambda b: (0, 0)),         # W_V
            pl.BlockSpec((1, HD), lambda b: (0, 0)),            # b_V
        ],
        out_specs=out_specs,
        scratch_shapes=[pltpu.VMEM((Bb, S, HD), in_dtype)] * 3,  # q/k/v projections
    )

    results = pl.pallas_call(
        kernel,
        out_shape=tuple(out_shapes),
        grid_spec=grid_spec,
        compiler_params=pltpu.CompilerParams(
            dimension_semantics=("parallel",),
            vmem_limit_bytes=vmem_limit),
    )(Qk, Kk, Vk, mask3, wq_c, bq_c, wk_c, wv_c, bv_c)

    output = results[0][:B]
    attn_w = results[1][:B] if return_weights else None
    if residual:
        # Like the torch module, only shape-valid when D_in == head_num*head_dim.
        output = output + Q
    return output, attn_w


# ---------------------------------------------------------------------------
# Pure-JAX reference (replicates the PyTorch forward) and test
# ---------------------------------------------------------------------------
def _reference(Q, K, V, mask, wq, bq, wk, wv, bv, head_num, head_dim):
    B, S, _ = Q.shape
    d = head_dim
    q = (Q @ wq + bq).reshape(B, S, head_num, d).transpose(0, 2, 1, 3)
    k = (K @ wk).reshape(B, S, head_num, d).transpose(0, 2, 1, 3)
    v = (V @ wv + bv).reshape(B, S, head_num, d).transpose(0, 2, 1, 3)
    scores = jnp.exp(jnp.einsum("bhqd,bhkd->bhqk", q, k) / math.sqrt(d))
    scores = scores * mask[:, None, None, :]
    attn_w = scores / (jnp.sum(scores, axis=-1, keepdims=True) + 1e-8)
    ctx = jnp.einsum("bhqk,bhkd->bhqd", attn_w, v)
    out = ctx.transpose(0, 2, 1, 3).reshape(B, S, head_num * d)
    return out, attn_w


def _xavier_uniform(key, fan_in, fan_out):
    limit = math.sqrt(6.0 / (fan_in + fan_out))
    return jax.random.uniform(key, (fan_in, fan_out), jnp.float32, -limit, limit)


if __name__ == "__main__":
    B, S, D_IN = 2, 8, 32
    HEAD_NUM, HEAD_DIM = 4, 8
    HD = HEAD_NUM * HEAD_DIM

    key = jax.random.PRNGKey(0)
    kq, kk, kv, kwq, kwk, kwv, kbq, kbv, kmask = jax.random.split(key, 9)

    Q = jax.random.normal(kq, (B, S, D_IN), jnp.float32)
    K = jax.random.normal(kk, (B, S, D_IN), jnp.float32)
    V = jax.random.normal(kv, (B, S, D_IN), jnp.float32)

    # xavier_uniform weights (as in the module); PyTorch-Linear-style uniform biases
    # (the separate .initialize() zeroing is not part of forward()).
    wq = _xavier_uniform(kwq, D_IN, HD)
    wk = _xavier_uniform(kwk, D_IN, HD)
    wv = _xavier_uniform(kwv, D_IN, HD)
    b_bound = 1.0 / math.sqrt(D_IN)
    bq = jax.random.uniform(kbq, (HD,), jnp.float32, -b_bound, b_bound)
    bv = jax.random.uniform(kbv, (HD,), jnp.float32, -b_bound, b_bound)

    # Key-padding-style mask (1.0 = keep, 0.0 = masked out).
    mask = jnp.ones((B, S), jnp.float32).at[1, -2:].set(0.0)

    ref_out, ref_attn = _reference(Q, K, V, mask, wq, bq, wk, wv, bv,
                                   HEAD_NUM, HEAD_DIM)

    # 1) Full forward (context + attention weights), f32 MXU path.
    out, attn_w = multi_head_attention(
        Q, K, V, mask, wq, bq, wk, wv, bv,
        head_num=HEAD_NUM, head_dim=HEAD_DIM, residual=False, mxu_bf16=False)
    out = jax.block_until_ready(out)
    attn_w = jax.block_until_ready(attn_w)

    assert out.shape == (B, S, HD) and attn_w.shape == (B, HEAD_NUM, S, S)
    # Tolerance is loose because the softmax denominator uses the EUP approximate
    # reciprocal (pl.reciprocal(..., approx=True)); structural bugs give O(1) errors.
    assert jnp.allclose(out, ref_out, atol=1e-2, rtol=1e-2)
    assert jnp.allclose(attn_w, ref_attn, atol=1e-2, rtol=1e-2)

    # 2) Context-only fast path (no attention-weights HBM writeback at all).
    out2, no_attn = multi_head_attention(
        Q, K, V, mask, wq, bq, wk, wv, bv,
        head_num=HEAD_NUM, head_dim=HEAD_DIM, return_weights=False)
    out2 = jax.block_until_ready(out2)
    assert no_attn is None
    assert jnp.allclose(out2, ref_out, atol=1e-2, rtol=1e-2)

    print("KERNEL_OK")
</pallas_src>

<mosaic_0001>
module attributes {stable_mosaic.version = 11 : i64} {
  func.func @kernel(%arg0: i32, %arg1: memref<1x8x32xf32, #tpu.memory_space<vmem>>, %arg2: memref<1x8x32xf32, #tpu.memory_space<vmem>>, %arg3: memref<1x8x32xf32, #tpu.memory_space<vmem>>, %arg4: memref<1x1x8xf32, #tpu.memory_space<vmem>>, %arg5: memref<32x32xf32, #tpu.memory_space<vmem>>, %arg6: memref<1x32xf32, #tpu.memory_space<vmem>>, %arg7: memref<32x32xf32, #tpu.memory_space<vmem>>, %arg8: memref<32x32xf32, #tpu.memory_space<vmem>>, %arg9: memref<1x32xf32, #tpu.memory_space<vmem>>, %arg10: memref<1x8x32xf32, #tpu.memory_space<vmem>>, %arg11: memref<1x4x8x8xf32, #tpu.memory_space<vmem>>, %arg12: memref<1x8x32xf32, #tpu.memory_space<vmem>>, %arg13: memref<1x8x32xf32, #tpu.memory_space<vmem>>, %arg14: memref<1x8x32xf32, #tpu.memory_space<vmem>>) attributes {dimension_semantics = [#tpu.dimension_semantics<parallel>], iteration_bounds = array<i64: 2>, scalar_prefetch = 0 : i64, scratch_operands = 3 : i64, tpu.core_type = #tpu.core_type<tc>, window_params = [{transform_indices = @transform_0, window_bounds = array<i64: 1, 8, 32>}, {transform_indices = @transform_1, window_bounds = array<i64: 1, 8, 32>}, {transform_indices = @transform_2, window_bounds = array<i64: 1, 8, 32>}, {transform_indices = @transform_3, window_bounds = array<i64: 1, 1, 8>}, {pipeline_mode = #tpu.pipeline_mode<synchronous>, transform_indices = @transform_4, window_bounds = array<i64: 32, 32>}, {pipeline_mode = #tpu.pipeline_mode<synchronous>, transform_indices = @transform_5, window_bounds = array<i64: 1, 32>}, {pipeline_mode = #tpu.pipeline_mode<synchronous>, transform_indices = @transform_6, window_bounds = array<i64: 32, 32>}, {pipeline_mode = #tpu.pipeline_mode<synchronous>, transform_indices = @transform_7, window_bounds = array<i64: 32, 32>}, {pipeline_mode = #tpu.pipeline_mode<synchronous>, transform_indices = @transform_8, window_bounds = array<i64: 1, 32>}, {transform_indices = @transform_9, window_bounds = array<i64: 1, 8, 32>}, {transform_indices = @transform_10, window_bounds = array<i64: 1, 4, 8, 8>}]} {
    %c0 = arith.constant 0 : index
    %c0_0 = arith.constant 0 : index
    %c0_1 = arith.constant 0 : index
    %0 = vector.load %arg1[%c0, %c0_0, %c0_1] : memref<1x8x32xf32, #tpu.memory_space<vmem>>, vector<1x8x32xf32>
    %1 = vector.shape_cast %0 : vector<1x8x32xf32> to vector<8x32xf32>
    %c0_2 = arith.constant 0 : index
    %c0_3 = arith.constant 0 : index
    %c0_4 = arith.constant 0 : index
    %2 = vector.load %arg2[%c0_2, %c0_3, %c0_4] : memref<1x8x32xf32, #tpu.memory_space<vmem>>, vector<1x8x32xf32>
    %3 = vector.shape_cast %2 : vector<1x8x32xf32> to vector<8x32xf32>
    %c0_5 = arith.constant 0 : index
    %c0_6 = arith.constant 0 : index
    %c0_7 = arith.constant 0 : index
    %4 = vector.load %arg3[%c0_5, %c0_6, %c0_7] : memref<1x8x32xf32, #tpu.memory_space<vmem>>, vector<1x8x32xf32>
    %5 = vector.shape_cast %4 : vector<1x8x32xf32> to vector<8x32xf32>
    %c0_8 = arith.constant 0 : index
    %c0_9 = arith.constant 0 : index
    %6 = vector.load %arg5[%c0_8, %c0_9] : memref<32x32xf32, #tpu.memory_space<vmem>>, vector<32x32xf32>
    %cst = arith.constant dense<0.000000e+00> : vector<8x32xf32>
    %7 = tpu.matmul %1, %6, %cst {dimension_numbers = #tpu.dot_dimension_numbers<[1], [0], [0], [1], [0, 0, 1, 1], [], []>} : vector<8x32xf32>, vector<32x32xf32>, vector<8x32xf32> -> vector<8x32xf32>
    %c0_10 = arith.constant 0 : index
    %c0_11 = arith.constant 0 : index
    %8 = vector.load %arg6[%c0_10, %c0_11] : memref<1x32xf32, #tpu.memory_space<vmem>>, vector<1x32xf32>
    %9 = vector.broadcast %8 : vector<1x32xf32> to vector<8x32xf32>
    %10 = arith.addf %7, %9 : vector<8x32xf32>
    %c0_12 = arith.constant 0 : index
    %c0_13 = arith.constant 0 : index
    %11 = vector.load %arg7[%c0_12, %c0_13] : memref<32x32xf32, #tpu.memory_space<vmem>>, vector<32x32xf32>
    %cst_14 = arith.constant dense<0.000000e+00> : vector<8x32xf32>
    %12 = tpu.matmul %3, %11, %cst_14 {dimension_numbers = #tpu.dot_dimension_numbers<[1], [0], [0], [1], [0, 0, 1, 1], [], []>} : vector<8x32xf32>, vector<32x32xf32>, vector<8x32xf32> -> vector<8x32xf32>
    %c0_15 = arith.constant 0 : index
    %c0_16 = arith.constant 0 : index
    %13 = vector.load %arg8[%c0_15, %c0_16] : memref<32x32xf32, #tpu.memory_space<vmem>>, vector<32x32xf32>
    %cst_17 = arith.constant dense<0.000000e+00> : vector<8x32xf32>
    %14 = tpu.matmul %5, %13, %cst_17 {dimension_numbers = #tpu.dot_dimension_numbers<[1], [0], [0], [1], [0, 0, 1, 1], [], []>} : vector<8x32xf32>, vector<32x32xf32>, vector<8x32xf32> -> vector<8x32xf32>
    %c0_18 = arith.constant 0 : index
    %c0_19 = arith.constant 0 : index
    %15 = vector.load %arg9[%c0_18, %c0_19] : memref<1x32xf32, #tpu.memory_space<vmem>>, vector<1x32xf32>
    %16 = vector.broadcast %15 : vector<1x32xf32> to vector<8x32xf32>
    %17 = arith.addf %14, %16 : vector<8x32xf32>
    %cst_20 = arith.constant 0.353553385 : f32
    %18 = vector.broadcast %cst_20 : f32 to vector<8x32xf32>
    %19 = arith.mulf %10, %18 : vector<8x32xf32>
    %20 = vector.shape_cast %19 : vector<8x32xf32> to vector<1x8x32xf32>
    %c0_21 = arith.constant 0 : index
    %c0_22 = arith.constant 0 : index
    %c0_23 = arith.constant 0 : index
    %21 = vector.load %arg12[%c0_21, %c0_22, %c0_23] : memref<1x8x32xf32, #tpu.memory_space<vmem>>, vector<1x8x32xf32>
    tpu.vector_store %arg12[%c0_21, %c0_22, %c0_23], %20 {strides = array<i32>} : memref<1x8x32xf32, #tpu.memory_space<vmem>>, vector<1x8x32xf32>,
    %22 = vector.shape_cast %12 : vector<8x32xf32> to vector<1x8x32xf32>
    %c0_24 = arith.constant 0 : index
    %c0_25 = arith.constant 0 : index
    %c0_26 = arith.constant 0 : index
    %23 = vector.load %arg13[%c0_24, %c0_25, %c0_26] : memref<1x8x32xf32, #tpu.memory_space<vmem>>, vector<1x8x32xf32>
    tpu.vector_store %arg13[%c0_24, %c0_25, %c0_26], %22 {strides = array<i32>} : memref<1x8x32xf32, #tpu.memory_space<vmem>>, vector<1x8x32xf32>,
    %24 = vector.shape_cast %17 : vector<8x32xf32> to vector<1x8x32xf32>
    %c0_27 = arith.constant 0 : index
    %c0_28 = arith.constant 0 : index
    %c0_29 = arith.constant 0 : index
    %25 = vector.load %arg14[%c0_27, %c0_28, %c0_29] : memref<1x8x32xf32, #tpu.memory_space<vmem>>, vector<1x8x32xf32>
    tpu.vector_store %arg14[%c0_27, %c0_28, %c0_29], %24 {strides = array<i32>} : memref<1x8x32xf32, #tpu.memory_space<vmem>>, vector<1x8x32xf32>,
    %c0_30 = arith.constant 0 : index
    %c0_31 = arith.constant 0 : index
    %c0_32 = arith.constant 0 : index
    %26 = vector.load %arg4[%c0_30, %c0_31, %c0_32] : memref<1x1x8xf32, #tpu.memory_space<vmem>>, vector<1x1x8xf32>
    %c0_33 = arith.constant 0 : index
    %c0_34 = arith.constant 0 : index
    %c0_35 = arith.constant 0 : index
    %27 = vector.load %arg12[%c0_33, %c0_34, %c0_35] : memref<1x8x32xf32, #tpu.memory_space<vmem>>, vector<1x8x8xf32>
    %c0_36 = arith.constant 0 : index
    %c0_37 = arith.constant 0 : index
    %c0_38 = arith.constant 0 : index
    %28 = vector.load %arg13[%c0_36, %c0_37, %c0_38] : memref<1x8x32xf32, #tpu.memory_space<vmem>>, vector<1x8x8xf32>
    %c0_39 = arith.constant 0 : index
    %c0_40 = arith.constant 0 : index
    %c0_41 = arith.constant 0 : index
    %29 = vector.load %arg14[%c0_39, %c0_40, %c0_41] : memref<1x8x32xf32, #tpu.memory_space<vmem>>, vector<1x8x8xf32>
    %cst_42 = arith.constant dense<0.000000e+00> : vector<1x8x8xf32>
    %30 = tpu.matmul %27, %28, %cst_42 {dimension_numbers = #tpu.dot_dimension_numbers<[2], [2], [1], [1], [0, 0, 0, 1, 1, 1], [0], [0]>} : vector<1x8x8xf32>, vector<1x8x8xf32>, vector<1x8x8xf32> -> vector<1x8x8xf32>
    %31 = math.exp %30 : vector<1x8x8xf32>
    %32 = vector.broadcast %26 : vector<1x1x8xf32> to vector<1x8x8xf32>
    %33 = arith.mulf %31, %32 : vector<1x8x8xf32>
    %cst_43 = arith.constant dense<0.000000e+00> : vector<1x8xf32>
    %34 = vector.multi_reduction <add>, %33, %cst_43 [2] : vector<1x8x8xf32> to vector<1x8xf32>
    %35 = vector.shape_cast %34 : vector<1x8xf32> to vector<1x8x1xf32>
    %cst_44 = arith.constant 9.99999993E-9 : f32
    %36 = vector.broadcast %cst_44 : f32 to vector<1x8x1xf32>
    %37 = arith.addf %35, %36 : vector<1x8x1xf32>
    %38 = tpu.reciprocal %37 {approx = true} : vector<1x8x1xf32> -> vector<1x8x1xf32>
    %39 = vector.broadcast %38 : vector<1x8x1xf32> to vector<1x8x8xf32>
    %40 = arith.mulf %33, %39 : vector<1x8x8xf32>
    %cst_45 = arith.constant dense<0.000000e+00> : vector<1x8x8xf32>
    %41 = tpu.matmul %40, %29, %cst_45 {dimension_numbers = #tpu.dot_dimension_numbers<[2], [1], [1], [2], [0, 0, 0, 1, 1, 2], [0], [0]>} : vector<1x8x8xf32>, vector<1x8x8xf32>, vector<1x8x8xf32> -> vector<1x8x8xf32>
    %c0_46 = arith.constant 0 : index
    %c0_47 = arith.constant 0 : index
    %c0_48 = arith.constant 0 : index
    %42 = vector.load %arg10[%c0_46, %c0_47, %c0_48] : memref<1x8x32xf32, #tpu.memory_space<vmem>>, vector<1x8x8xf32>
    tpu.vector_store %arg10[%c0_46, %c0_47, %c0_48], %41 {strides = array<i32>} : memref<1x8x32xf32, #tpu.memory_space<vmem>>, vector<1x8x8xf32>,
    %c0_49 = arith.constant 0 : index
    %c0_50 = arith.constant 0 : index
    %c0_51 = arith.constant 0 : index
    %c0_52 = arith.constant 0 : index
    %43 = vector.load %arg11[%c0_49, %c0_50, %c0_51, %c0_52] : memref<1x4x8x8xf32, #tpu.memory_space<vmem>>, vector<1x1x8x8xf32>
    %44 = vector.shape_cast %43 : vector<1x1x8x8xf32> to vector<1x8x8xf32>
    %45 = vector.shape_cast %40 : vector<1x8x8xf32> to vector<1x1x8x8xf32>
    tpu.vector_store %arg11[%c0_49, %c0_50, %c0_51, %c0_52], %45 {strides = array<i32>} : memref<1x4x8x8xf32, #tpu.memory_space<vmem>>, vector<1x1x8x8xf32>,
    %c0_53 = arith.constant 0 : index
    %c0_54 = arith.constant 0 : index
    %c8 = arith.constant 8 : index
    %46 = vector.load %arg12[%c0_53, %c0_54, %c8] : memref<1x8x32xf32, #tpu.memory_space<vmem>>, vector<1x8x8xf32>
    %c0_55 = arith.constant 0 : index
    %c0_56 = arith.constant 0 : index
    %c8_57 = arith.constant 8 : index
    %47 = vector.load %arg13[%c0_55, %c0_56, %c8_57] : memref<1x8x32xf32, #tpu.memory_space<vmem>>, vector<1x8x8xf32>
    %c0_58 = arith.constant 0 : index
    %c0_59 = arith.constant 0 : index
    %c8_60 = arith.constant 8 : index
    %48 = vector.load %arg14[%c0_58, %c0_59, %c8_60] : memref<1x8x32xf32, #tpu.memory_space<vmem>>, vector<1x8x8xf32>
    %cst_61 = arith.constant dense<0.000000e+00> : vector<1x8x8xf32>
    %49 = tpu.matmul %46, %47, %cst_61 {dimension_numbers = #tpu.dot_dimension_numbers<[2], [2], [1], [1], [0, 0, 0, 1, 1, 1], [0], [0]>} : vector<1x8x8xf32>, vector<1x8x8xf32>, vector<1x8x8xf32> -> vector<1x8x8xf32>
    %50 = math.exp %49 : vector<1x8x8xf32>
    %51 = vector.broadcast %26 : vector<1x1x8xf32> to vector<1x8x8xf32>
    %52 = arith.mulf %50, %51 : vector<1x8x8xf32>
    %cst_62 = arith.constant dense<0.000000e+00> : vector<1x8xf32>
    %53 = vector.multi_reduction <add>, %52, %cst_62 [2] : vector<1x8x8xf32> to vector<1x8xf32>
    %54 = vector.shape_cast %53 : vector<1x8xf32> to vector<1x8x1xf32>
    %cst_63 = arith.constant 9.99999993E-9 : f32
    %55 = vector.broadcast %cst_63 : f32 to vector<1x8x1xf32>
    %56 = arith.addf %54, %55 : vector<1x8x1xf32>
    %57 = tpu.reciprocal %56 {approx = true} : vector<1x8x1xf32> -> vector<1x8x1xf32>
    %58 = vector.broadcast %57 : vector<1x8x1xf32> to vector<1x8x8xf32>
    %59 = arith.mulf %52, %58 : vector<1x8x8xf32>
    %cst_64 = arith.constant dense<0.000000e+00> : vector<1x8x8xf32>
    %60 = tpu.matmul %59, %48, %cst_64 {dimension_numbers = #tpu.dot_dimension_numbers<[2], [1], [1], [2], [0, 0, 0, 1, 1, 2], [0], [0]>} : vector<1x8x8xf32>, vector<1x8x8xf32>, vector<1x8x8xf32> -> vector<1x8x8xf32>
    %c0_65 = arith.constant 0 : index
    %c0_66 = arith.constant 0 : index
    %c8_67 = arith.constant 8 : index
    %61 = vector.load %arg10[%c0_65, %c0_66, %c8_67] : memref<1x8x32xf32, #tpu.memory_space<vmem>>, vector<1x8x8xf32>
    tpu.vector_store %arg10[%c0_65, %c0_66, %c8_67], %60 {strides = array<i32>} : memref<1x8x32xf32, #tpu.memory_space<vmem>>, vector<1x8x8xf32>,
    %c0_68 = arith.constant 0 : index
    %c1 = arith.constant 1 : index
    %c0_69 = arith.constant 0 : index
    %c0_70 = arith.constant 0 : index
    %62 = vector.load %arg11[%c0_68, %c1, %c0_69, %c0_70] : memref<1x4x8x8xf32, #tpu.memory_space<vmem>>, vector<1x1x8x8xf32>
    %63 = vector.shape_cast %62 : vector<1x1x8x8xf32> to vector<1x8x8xf32>
    %64 = vector.shape_cast %59 : vector<1x8x8xf32> to vector<1x1x8x8xf32>
    tpu.vector_store %arg11[%c0_68, %c1, %c0_69, %c0_70], %64 {strides = array<i32>} : memref<1x4x8x8xf32, #tpu.memory_space<vmem>>, vector<1x1x8x8xf32>,
    %c0_71 = arith.constant 0 : index
    %c0_72 = arith.constant 0 : index
    %c16 = arith.constant 16 : index
    %65 = vector.load %arg12[%c0_71, %c0_72, %c16] : memref<1x8x32xf32, #tpu.memory_space<vmem>>, vector<1x8x8xf32>
    %c0_73 = arith.constant 0 : index
    %c0_74 = arith.constant 0 : index
    %c16_75 = arith.constant 16 : index
    %66 = vector.load %arg13[%c0_73, %c0_74, %c16_75] : memref<1x8x32xf32, #tpu.memory_space<vmem>>, vector<1x8x8xf32>
    %c0_76 = arith.constant 0 : index
    %c0_77 = arith.constant 0 : index
    %c16_78 = arith.constant 16 : index
    %67 = vector.load %arg14[%c0_76, %c0_77, %c16_78] : memref<1x8x32xf32, #tpu.memory_space<vmem>>, vector<1x8x8xf32>
    %cst_79 = arith.constant dense<0.000000e+00> : vector<1x8x8xf32>
    %68 = tpu.matmul %65, %66, %cst_79 {dimension_numbers = #tpu.dot_dimension_numbers<[2], [2], [1], [1], [0, 0, 0, 1, 1, 1], [0], [0]>} : vector<1x8x8xf32>, vector<1x8x8xf32>, vector<1x8x8xf32> -> vector<1x8x8xf32>
    %69 = math.exp %68 : vector<1x8x8xf32>
    %70 = vector.broadcast %26 : vector<1x1x8xf32> to vector<1x8x8xf32>
    %71 = arith.mulf %69, %70 : vector<1x8x8xf32>
    %cst_80 = arith.constant dense<0.000000e+00> : vector<1x8xf32>
    %72 = vector.multi_reduction <add>, %71, %cst_80 [2] : vector<1x8x8xf32> to vector<1x8xf32>
    %73 = vector.shape_cast %72 : vector<1x8xf32> to vector<1x8x1xf32>
    %cst_81 = arith.constant 9.99999993E-9 : f32
    %74 = vector.broadcast %cst_81 : f32 to vector<1x8x1xf32>
    %75 = arith.addf %73, %74 : vector<1x8x1xf32>
    %76 = tpu.reciprocal %75 {approx = true} : vector<1x8x1xf32> -> vector<1x8x1xf32>
    %77 = vector.broadcast %76 : vector<1x8x1xf32> to vector<1x8x8xf32>
    %78 = arith.mulf %71, %77 : vector<1x8x8xf32>
    %cst_82 = arith.constant dense<0.000000e+00> : vector<1x8x8xf32>
    %79 = tpu.matmul %78, %67, %cst_82 {dimension_numbers = #tpu.dot_dimension_numbers<[2], [1], [1], [2], [0, 0, 0, 1, 1, 2], [0], [0]>} : vector<1x8x8xf32>, vector<1x8x8xf32>, vector<1x8x8xf32> -> vector<1x8x8xf32>
    %c0_83 = arith.constant 0 : index
    %c0_84 = arith.constant 0 : index
    %c16_85 = arith.constant 16 : index
    %80 = vector.load %arg10[%c0_83, %c0_84, %c16_85] : memref<1x8x32xf32, #tpu.memory_space<vmem>>, vector<1x8x8xf32>
    tpu.vector_store %arg10[%c0_83, %c0_84, %c16_85], %79 {strides = array<i32>} : memref<1x8x32xf32, #tpu.memory_space<vmem>>, vector<1x8x8xf32>,
    %c0_86 = arith.constant 0 : index
    %c2 = arith.constant 2 : index
    %c0_87 = arith.constant 0 : index
    %c0_88 = arith.constant 0 : index
    %81 = vector.load %arg11[%c0_86, %c2, %c0_87, %c0_88] : memref<1x4x8x8xf32, #tpu.memory_space<vmem>>, vector<1x1x8x8xf32>
    %82 = vector.shape_cast %81 : vector<1x1x8x8xf32> to vector<1x8x8xf32>
    %83 = vector.shape_cast %78 : vector<1x8x8xf32> to vector<1x1x8x8xf32>
    tpu.vector_store %arg11[%c0_86, %c2, %c0_87, %c0_88], %83 {strides = array<i32>} : memref<1x4x8x8xf32, #tpu.memory_space<vmem>>, vector<1x1x8x8xf32>,
    %c0_89 = arith.constant 0 : index
    %c0_90 = arith.constant 0 : index
    %c24 = arith.constant 24 : index
    %84 = vector.load %arg12[%c0_89, %c0_90, %c24] : memref<1x8x32xf32, #tpu.memory_space<vmem>>, vector<1x8x8xf32>
    %c0_91 = arith.constant 0 : index
    %c0_92 = arith.constant 0 : index
    %c24_93 = arith.constant 24 : index
    %85 = vector.load %arg13[%c0_91, %c0_92, %c24_93] : memref<1x8x32xf32, #tpu.memory_space<vmem>>, vector<1x8x8xf32>
    %c0_94 = arith.constant 0 : index
    %c0_95 = arith.constant 0 : index
    %c24_96 = arith.constant 24 : index
    %86 = vector.load %arg14[%c0_94, %c0_95, %c24_96] : memref<1x8x32xf32, #tpu.memory_space<vmem>>, vector<1x8x8xf32>
    %cst_97 = arith.constant dense<0.000000e+00> : vector<1x8x8xf32>
    %87 = tpu.matmul %84, %85, %cst_97 {dimension_numbers = #tpu.dot_dimension_numbers<[2], [2], [1], [1], [0, 0, 0, 1, 1, 1], [0], [0]>} : vector<1x8x8xf32>, vector<1x8x8xf32>, vector<1x8x8xf32> -> vector<1x8x8xf32>
    %88 = math.exp %87 : vector<1x8x8xf32>
    %89 = vector.broadcast %26 : vector<1x1x8xf32> to vector<1x8x8xf32>
    %90 = arith.mulf %88, %89 : vector<1x8x8xf32>
    %cst_98 = arith.constant dense<0.000000e+00> : vector<1x8xf32>
    %91 = vector.multi_reduction <add>, %90, %cst_98 [2] : vector<1x8x8xf32> to vector<1x8xf32>
    %92 = vector.shape_cast %91 : vector<1x8xf32> to vector<1x8x1xf32>
    %cst_99 = arith.constant 9.99999993E-9 : f32
    %93 = vector.broadcast %cst_99 : f32 to vector<1x8x1xf32>
    %94 = arith.addf %92, %93 : vector<1x8x1xf32>
    %95 = tpu.reciprocal %94 {approx = true} : vector<1x8x1xf32> -> vector<1x8x1xf32>
    %96 = vector.broadcast %95 : vector<1x8x1xf32> to vector<1x8x8xf32>
    %97 = arith.mulf %90, %96 : vector<1x8x8xf32>
    %cst_100 = arith.constant dense<0.000000e+00> : vector<1x8x8xf32>
    %98 = tpu.matmul %97, %86, %cst_100 {dimension_numbers = #tpu.dot_dimension_numbers<[2], [1], [1], [2], [0, 0, 0, 1, 1, 2], [0], [0]>} : vector<1x8x8xf32>, vector<1x8x8xf32>, vector<1x8x8xf32> -> vector<1x8x8xf32>
    %c0_101 = arith.constant 0 : index
    %c0_102 = arith.constant 0 : index
    %c24_103 = arith.constant 24 : index
    %99 = vector.load %arg10[%c0_101, %c0_102, %c24_103] : memref<1x8x32xf32, #tpu.memory_space<vmem>>, vector<1x8x8xf32>
    tpu.vector_store %arg10[%c0_101, %c0_102, %c24_103], %98 {strides = array<i32>} : memref<1x8x32xf32, #tpu.memory_space<vmem>>, vector<1x8x8xf32>,
    %c0_104 = arith.constant 0 : index
    %c3 = arith.constant 3 : index
    %c0_105 = arith.constant 0 : index
    %c0_106 = arith.constant 0 : index
    %100 = vector.load %arg11[%c0_104, %c3, %c0_105, %c0_106] : memref<1x4x8x8xf32, #tpu.memory_space<vmem>>, vector<1x1x8x8xf32>
    %101 = vector.shape_cast %100 : vector<1x1x8x8xf32> to vector<1x8x8xf32>
    %102 = vector.shape_cast %97 : vector<1x8x8xf32> to vector<1x1x8x8xf32>
    tpu.vector_store %arg11[%c0_104, %c3, %c0_105, %c0_106], %102 {strides = array<i32>} : memref<1x4x8x8xf32, #tpu.memory_space<vmem>>, vector<1x1x8x8xf32>,
    return
  }
  func.func @transform_0(%arg0: i32) -> (i32, i32, i32) {
    %c0_i32 = arith.constant 0 : i32
    %c0_i32_0 = arith.constant 0 : i32
    %c0_i32_1 = arith.constant 0 : i32
    return %arg0, %c0_i32, %c0_i32_0 : i32, i32, i32
  }
  func.func @transform_1(%arg0: i32) -> (i32, i32, i32) {
    %c0_i32 = arith.constant 0 : i32
    %c0_i32_0 = arith.constant 0 : i32
    %c0_i32_1 = arith.constant 0 : i32
    return %arg0, %c0_i32, %c0_i32_0 : i32, i32, i32
  }
  func.func @transform_2(%arg0: i32) -> (i32, i32, i32) {
    %c0_i32 = arith.constant 0 : i32
    %c0_i32_0 = arith.constant 0 : i32
    %c0_i32_1 = arith.constant 0 : i32
    return %arg0, %c0_i32, %c0_i32_0 : i32, i32, i32
  }
  func.func @transform_3(%arg0: i32) -> (i32, i32, i32) {
    %c0_i32 = arith.constant 0 : i32
    %c0_i32_0 = arith.constant 0 : i32
    %c0_i32_1 = arith.constant 0 : i32
    return %arg0, %c0_i32, %c0_i32_0 : i32, i32, i32
  }
  func.func @transform_4(%arg0: i32) -> (i32, i32) {
    %c0_i32 = arith.constant 0 : i32
    %c0_i32_0 = arith.constant 0 : i32
    %c0_i32_1 = arith.constant 0 : i32
    return %c0_i32, %c0_i32_0 : i32, i32
  }
  func.func @transform_5(%arg0: i32) -> (i32, i32) {
    %c0_i32 = arith.constant 0 : i32
    %c0_i32_0 = arith.constant 0 : i32
    %c0_i32_1 = arith.constant 0 : i32
    return %c0_i32, %c0_i32_0 : i32, i32
  }
  func.func @transform_6(%arg0: i32) -> (i32, i32) {
    %c0_i32 = arith.constant 0 : i32
    %c0_i32_0 = arith.constant 0 : i32
    %c0_i32_1 = arith.constant 0 : i32
    return %c0_i32, %c0_i32_0 : i32, i32
  }
  func.func @transform_7(%arg0: i32) -> (i32, i32) {
    %c0_i32 = arith.constant 0 : i32
    %c0_i32_0 = arith.constant 0 : i32
    %c0_i32_1 = arith.constant 0 : i32
    return %c0_i32, %c0_i32_0 : i32, i32
  }
  func.func @transform_8(%arg0: i32) -> (i32, i32) {
    %c0_i32 = arith.constant 0 : i32
    %c0_i32_0 = arith.constant 0 : i32
    %c0_i32_1 = arith.constant 0 : i32
    return %c0_i32, %c0_i32_0 : i32, i32
  }
  func.func @transform_9(%arg0: i32) -> (i32, i32, i32) {
    %c0_i32 = arith.constant 0 : i32
    %c0_i32_0 = arith.constant 0 : i32
    %c0_i32_1 = arith.constant 0 : i32
    return %arg0, %c0_i32, %c0_i32_0 : i32, i32, i32
  }
  func.func @transform_10(%arg0: i32) -> (i32, i32, i32, i32) {
    %c0_i32 = arith.constant 0 : i32
    %c0_i32_0 = arith.constant 0 : i32
    %c0_i32_1 = arith.constant 0 : i32
    %c0_i32_2 = arith.constant 0 : i32
    return %arg0, %c0_i32, %c0_i32_0, %c0_i32_1 : i32, i32, i32, i32
  }
}

</mosaic_0001>

<bundles_post_ra>
// kernel: tpu_custom_call.1
= control target key start
LH: loop header
LB: loop body
LE: loop exit
PB: predicated region body
PF: predicated region fallthrough
CT: control target
= control target key end

     0   :  { %s2805_s0 = inlined_call_operand.hbm [shape: f32[2,8,32], index: 0, kind: input, shape index: {}]   ;;  %s2806_s1 = inlined_call_operand.hbm [shape: f32[2,8,32], index: 1, kind: input, shape index: {}]   ;;  %s2807_s2 = inlined_call_operand.hbm [shape: f32[2,8,32], index: 2, kind: input, shape index: {}]   ;;  %s2808_s3 = inlined_call_operand.vmem [shape: f32[2,1,8], index: 3, kind: input, shape index: {}]   ;;  %s2809_s4 = inlined_call_operand.hbm [shape: f32[32,32], index: 4, kind: input, shape index: {}]   ;;  %s2810_s5 = inlined_call_operand.vmem [shape: f32[1,32], index: 5, kind: input, shape index: {}]   ;;  %s2811_s6 = inlined_call_operand.hbm [shape: f32[32,32], index: 6, kind: input, shape index: {}]   ;;  %s2812_s7 = inlined_call_operand.hbm [shape: f32[32,32], index: 7, kind: input, shape index: {}]   ;;  %s2813_s8 = inlined_call_operand.vmem [shape: f32[1,32], index: 8, kind: input, shape index: {}]   ;;  %s2814_s9 = inlined_call_operand.hbm [shape: f32[2,8,32], index: 9, kind: output, shape index: {0}]   ;;  %s2815_s10 = inlined_call_operand.hbm [shape: f32[2,4,8,8], index: 10, kind: output, shape index: {1}]  }
   0x1   :  { %2842 = sst [smem:[#allocation31_spill]] %s2806_s1 }
   0x2   :  { %2843 = sst [smem:[#allocation32_spill]] %s2808_s3 }
   0x3   :  { %2844 = sst [smem:[#allocation33_spill]] %s2809_s4 }
   0x4   :  { %2845 = sst [smem:[#allocation34_spill]] %s2814_s9 }
   0x5   :  { %2846 = sst [smem:[#allocation35_spill]] %s2815_s10 }
   0x6   :  { %16 = vsyncpa [#allocation6], 0 }
   0x7   :  { %18 = vsyncpa [#allocation6 + $0x1], 0 }
   0x8   :  { %19 = vsyncpa [#allocation9], 0 }
   0x9   :  { %21 = vsyncpa [#allocation9 + $0x1], 0 }
   0xa   :  { %22 = vsyncpa [#allocation12], 0 }
   0xb   :  { %23 = vsyncpa [#allocation15], 0 }
   0xc   :  { %24 = vsyncpa [#allocation7], 0 }
   0xd   :  { %26 = vsyncpa [#allocation7 + $0x1], 0 }
   0xe   :  { %27 = vsyncpa [#allocation18], 0 }
   0xf   :  { %29 = vsyncpa [#allocation18 + $0x1], 0  ;;  %s2341_s13 = smov 0   ;;  %s2343_s14 = smov 0  }
  0x10   :  { %s2345_s15 = smov 0   ;;  %s2347_s16 = smov 0  }
  0x11 LB: > { %2847 = sst [smem:[#allocation25_spill]] %s2252_s13  ;;  %s2362_s17 = sadd.s32 4294967295, %s2264_s16   ;;  %s2264_s16 = sphi %s2347_s16, %s2888_s16   ;;  %s2260_s15 = sphi %s2345_s15, %s2892_s15   ;;  %s2256_s14 = sphi %s2343_s14, %s2891_s14   ;;  %s2252_s13 = sphi %s2341_s13, %s2890_s13  }
  0x12   : > { %2848 = sst [smem:[#allocation26_spill]] %s2264_s16  ;;  %s1688_s18 = sadd.s32 4294967294, %s2264_s16  }
  0x13   : > { %p55_p0 = scmp.ne.s32.totalorder %s2256_s14, %s2252_s13  ;;  %p2817_p1 = scmp.eq.s32.totalorder %s2362_s17, 0 }
  0x14   : > { %p268_p3 = scmp.eq.s32.totalorder %s1688_s18, 1  ;;  %p1689_p5 = scmp.ge.s32.totalorder %s2264_s16, 1 }
  0x15   : > { %p2371_p4 = por %p2817_p1, %p55_p0  ;;  %p301_p7 = scmp.lt.s32.totalorder %s2264_s16, 3 }
  0x16   : > { %p2376_p6 = por %p268_p3, %p55_p0  ;;  %s2266_s22 = smov [#allocation11]  }
  0x17   : > { %s2849_s19 = scalar_select %p2371_p4, 1, 0 }
  0x18   : > { %s2850_s20 = scalar_select %p2376_p6, 1, 0 }
  0x19   : > { %p2381_p8 = pnand %p1689_p5, %p301_p7  ;;  %s313_s23 = sshll.u32 %s2266_s22, 4  ;;  %s2385_s23 = int_to_ptr.vmem [resolvable:$true] %s313_s23 }
  0x1a   : > { %2851 = sst [smem:[#allocation27_spill]] %s2850_s20  ;;  %s2397_s25 = sadd.s32 1, %s2264_s16  }
  0x1b   : > { %s2852_s21 = scalar_select %p2381_p8, 1, 0 }
  0x1c   : > { %p1882_p9 = pneg %p2381_p8  ;;  %2854 = sst [smem:[#allocation28_spill]] %s2397_s25 }
  0x1d   : > { %s42_s26 = sadd.s32 1, %s2260_s15  ;;  %s39_s27 = ssub.s32 %s2264_s16, %s2397_s25 }
  0x1e   : > { %p2392_p11 = pnand %p1882_p9, %p2817_p1  ;;  %s2855_s4 = sld [smem:[#allocation33_spill]] }
  0x20   : > { %s2853_s24 = scalar_select %p2392_p11, 1, 0 }
  0x21   : > { %p2410_p13 = pneg %p2392_p11 }
  0x23   : > { %s2856_s18 = scalar_select %p2410_p13, 1, 0 }
  0x24   : > { %s1980_s30 = scalar_lea.hbm %s2855_s4, 512 }
  0x25   : > { %p1981_p12 = scmp.ne.s32.totalorder %s2855_s4, %s1980_s30  ;;  %p1987_p5 = scmp.lt.u32.totalorder %s1980_s30, %s2855_s4 }
  0x27   : > { %p1983_p0 = pnand %p2410_p13, %p1981_p12 }
  0x29   : > { %p1984_p3 = pneg %p1983_p0 }
  0x2b   : > { %p1989_p7 = pnand %p1987_p5, %p1984_p3 }
  0x2d   : > { %1992 = shalt.err (!%p1989_p7)
}
  0x2e   : > { %s1993_s28 = scalar_lea.vmem %s2385_s23, 512  ;;  %p2001_p2 = scmp.lt.s32.totalorder %s2385_s23, %s2385_s23 }
  0x2f   : > { %p1994_p9 = scmp.ne.s32.totalorder %s2385_s23, %s1993_s28  ;;  %p2002_p6 = scmp.lt.s32.totalorder %s1993_s28, %s1993_s28 }
  0x31   : > { %p1996_p10 = pnand %p1994_p9, %p2410_p13  ;;  %p2003_p12 = por %p2002_p6, %p2001_p2 }
  0x33   : > { %p1997_p1 = pneg %p1996_p10 }
  0x35   : > { %p2004_p0 = pnand %p2003_p12, %p1997_p1 }
  0x37   : > { %2007 = shalt.err (!%p2004_p0)
}
  0x38   : > { %s2821_s29 = smov 128   ;;  %s2823_s20 = smov 8  }
  0x39   : > { %1885 = dma.hbm_to_vmem [thread:$0]  (!%p2392_p11), %s2855_s4, 512, %s2385_s23, [#allocation12], %s2821_s29, %s2821_s29, %s2823_s20  }
  0x3a   : > { %p40_p1 = scmp.eq.s32.totalorder %s39_s27, 0  ;;  %p49_p2 = scmp.ne.s32.totalorder %s2260_s15, %s2256_s14 }
  0x3b   : > { %p50_p6 = scmp.eq.s32.totalorder %s2264_s16, 0  ;;  %p1912_p10 = scmp.lt.s32.totalorder %s2264_s16, 2 }
  0x3c   : > { %s2439_s12 = scalar_select %p40_p1, %s2260_s15, %s42_s26  }
  0x3d   : > { %p51_p3 = por %p50_p6, %p49_p2  ;;  %p2858_p5 = scmp.eq.s32.totalorder %s2362_s17, 1 }
  0x3e   : > { %2857 = sst [smem:[#allocation29_spill]] %s2439_s12  ;;  %s2825_s28 = sand.u32 1, %s2260_s15  }
  0x3f   : > { %p2443_p7 = por %p2858_p5, %p49_p2  ;;  %s2449_s25 = sshll.u32 %s2264_s16, 7 }
  0x40   : > { %s2453_s13 = sshll.u32 %s2825_s28, 3  ;;  %p2455_p9 = pnand %p1912_p10, %p51_p3 }
  0x41   : > { %s2859_s22 = scalar_select %p2443_p7, 1, 0 }
  0x42   : > { %s2861_s23 = scalar_select %p2455_p9, 1, 0 }
  0x43   : > { %2860 = sst [smem:[#allocation30_spill]] %s2859_s22  ;;  %s377_s26 = sand.u32 1, %s2264_s16  }
  0x44   : > { %s2862_s1 = sld [smem:[#allocation31_spill]]  ;;  %s381_s29 = scalar_lea.vmem [#allocation8], %s2453_s13 }
  0x45   : > { %s388_s20 = sshll.u32 %s381_s29, 4  ;;  %s2469_s28 = scalar_lea.sflag [#allocation9], %s377_s26  ;;  %s2467_s20 = int_to_ptr.vmem [resolvable:$true] %s388_s20 }
  0x46   : > { %p2475_p0 = pneg %p2455_p9 }
  0x48   : > { %s2863_s12 = scalar_select %p2475_p0, 1, 0 }
  0x4a   : > { %s2464_s11 = scalar_lea.hbm %s2862_s1, %s2449_s25  ;;  %s2013_s16 = scalar_lea.hbm %s2862_s1, 256 }
  0x4b   : > { %s2008_s4 = scalar_lea.hbm %s2464_s11, 128  ;;  %p2014_p6 = scmp.lt.u32.totalorder %s2464_s11, %s2862_s1 }
  0x4c   : > { %p2009_p12 = scmp.ne.s32.totalorder %s2464_s11, %s2008_s4  ;;  %p2015_p10 = scmp.lt.u32.totalorder %s2013_s16, %s2008_s4 }
  0x4d   : > { %p2017_p5 = scmp.lt.u32.totalorder %s2008_s4, %s2464_s11 }
  0x4e   : > { %p2011_p1 = pnand %p2475_p0, %p2009_p12  ;;  %p2016_p3 = por %p2015_p10, %p2014_p6 }
  0x50   : > { %p2012_p2 = pneg %p2011_p1  ;;  %p2018_p7 = por %p2017_p5, %p2016_p3 }
  0x52   : > { %p2019_p4 = pnand %p2018_p7, %p2012_p2 }
  0x54   : > { %2022 = shalt.err (!%p2019_p4)
}
  0x55   : > { %s2023_s26 = scalar_lea.vmem %s2467_s20, 128  ;;  %s2269_s27 = smov [#allocation8]  }
  0x56   : > { %p2024_p12 = scmp.ne.s32.totalorder %s2467_s20, %s2023_s26  ;;  %s2028_s30 = sshll.u32 %s2269_s27, 4  ;;  %s2029_s30 = int_to_ptr.vmem [resolvable:$false] %s2028_s30 }
  0x57   : > { %s2030_s9 = scalar_lea.vmem %s2029_s30, 256  ;;  %p2031_p11 = scmp.lt.s32.totalorder %s2467_s20, %s2029_s30 }
  0x58   : > { %p2026_p1 = pnand %p2024_p12, %p2475_p0  ;;  %p2032_p13 = scmp.lt.s32.totalorder %s2030_s9, %s2023_s26 }
  0x5a   : > { %p2027_p8 = pneg %p2026_p1  ;;  %p2033_p6 = por %p2032_p13, %p2031_p11 }
  0x5c   : > { %p2034_p10 = pnand %p2033_p6, %p2027_p8 }
  0x5e   : > { %2037 = shalt.err (!%p2034_p10)
}
  0x5f   : > { %1898 = dma.hbm_to_vmem [thread:$0]  (!%p2455_p9), %s2464_s11, 128, %s2467_s20, %s2469_s28  }
  0x60   : > { %s2270_s4 = smov [#allocation13]   ;;  %s2271_s29 = smov [#allocation14]  }
  0x61   : > { %s329_s16 = sshll.u32 %s2270_s4, 4  ;;  %s342_s1 = sshll.u32 %s2271_s29, 4  ;;  %s330_s16 = int_to_ptr.vmem [resolvable:$true] %s329_s16  ;;  %s343_s1 = int_to_ptr.vmem [resolvable:$true] %s342_s1 }
  0x62   : > { %s2038_s30 = scalar_lea.hbm %s2811_s6, 512  ;;  %p2864_p8 = scmp.ne.s32.totalorder %s2856_s18, 0 }
  0x63   : > { %p2039_p4 = scmp.ne.s32.totalorder %s2811_s6, %s2038_s30  ;;  %p2045_p7 = scmp.lt.u32.totalorder %s2038_s30, %s2811_s6 }
  0x65   : > { %p2041_p11 = pnand %p2039_p4, %p2864_p8 }
  0x67   : > { %p2042_p13 = pneg %p2041_p11 }
  0x69   : > { %p2047_p2 = pnand %p2045_p7, %p2042_p13 }
  0x6b   : > { %2050 = shalt.err (!%p2047_p2)
}
  0x6c   : > { %s2051_s20 = scalar_lea.vmem %s330_s16, 512  ;;  %p2059_p1 = scmp.lt.s32.totalorder %s330_s16, %s330_s16 }
  0x6d   : > { %p2052_p3 = scmp.ne.s32.totalorder %s330_s16, %s2051_s20  ;;  %p2060_p6 = scmp.lt.s32.totalorder %s2051_s20, %s2051_s20 }
  0x6f   : > { %p2054_p5 = pnand %p2052_p3, %p2864_p8  ;;  %p2061_p10 = por %p2060_p6, %p2059_p1 }
  0x71   : > { %p2055_p12 = pneg %p2054_p5 }
  0x73   : > { %p2062_p9 = pnand %p2061_p10, %p2055_p12 }
  0x75   : > { %2065 = shalt.err (!%p2062_p9)
}
  0x76   : > { %p2865_p4 = scmp.ne.s32.totalorder %s2853_s24, 0  ;;  %s2866_s10 = smov 8  }
  0x77   : > { %s2867_s11 = smov 128   ;;  %s2066_s27 = scalar_lea.hbm %s2812_s7, 512 }
  0x78   : > { %1888 = dma.hbm_to_vmem [thread:$0]  (!%p2865_p4), %s2811_s6, 512, %s330_s16, [#allocation12], %s2867_s11, %s2867_s11, %s2866_s10  }
  0x79   : > { %p2067_p11 = scmp.ne.s32.totalorder %s2812_s7, %s2066_s27  ;;  %p2073_p7 = scmp.lt.u32.totalorder %s2066_s27, %s2812_s7 }
  0x7b   : > { %p2069_p9 = pnand %p2067_p11, %p2864_p8 }
  0x7d   : > { %p2070_p13 = pneg %p2069_p9 }
  0x7f   : > { %p2075_p2 = pnand %p2073_p7, %p2070_p13 }
  0x81   : > { %2078 = shalt.err (!%p2075_p2)
}
  0x82   : > { %s2079_s3 = scalar_lea.vmem %s343_s1, 512  ;;  %p2087_p1 = scmp.lt.s32.totalorder %s343_s1, %s343_s1 }
  0x83   : > { %p2080_p3 = scmp.ne.s32.totalorder %s343_s1, %s2079_s3  ;;  %p2088_p6 = scmp.lt.s32.totalorder %s2079_s3, %s2079_s3 }
  0x85   : > { %p2082_p5 = pnand %p2080_p3, %p2864_p8  ;;  %p2089_p10 = por %p2088_p6, %p2087_p1 }
  0x87   : > { %p2083_p12 = pneg %p2082_p5 }
  0x89   : > { %p2090_p0 = pnand %p2089_p10, %p2083_p12 }
  0x8b   : > { %2093 = shalt.err (!%p2090_p0)
}
  0x8c   : > { %1891 = dma.hbm_to_vmem [thread:$0]  (!%p2865_p4), %s2812_s7, 512, %s343_s1, [#allocation15], %s2867_s11, %s2867_s11, %s2866_s10  }
  0x8d   : > { %s2545_s29 = scalar_lea.hbm %s2805_s0, %s2449_s25  ;;  %s363_s24 = scalar_lea.vmem [#allocation5], %s2453_s13 }
  0x8e   : > { %s370_s27 = sshll.u32 %s363_s24, 4  ;;  %s2554_s9 = scalar_lea.hbm %s2807_s2, %s2449_s25  ;;  %s2548_s27 = int_to_ptr.vmem [resolvable:$true] %s370_s27 }
  0x8f   : > { %s2868_s20 = sand.u32 1, %s2260_s15   ;;  %s2094_s10 = scalar_lea.hbm %s2545_s29, 128 }
  0x90   : > { %s360_s1 = scalar_lea.sflag [#allocation6], %s2868_s20  ;;  %p2095_p0 = scmp.ne.s32.totalorder %s2545_s29, %s2094_s10 }
  0x91   : > { %p2869_p8 = scmp.ne.s32.totalorder %s2863_s12, 0  ;;  %s2099_s16 = scalar_lea.hbm %s2805_s0, 256 }
  0x92   : > { %p2100_p9 = scmp.lt.u32.totalorder %s2545_s29, %s2805_s0  ;;  %p2101_p13 = scmp.lt.u32.totalorder %s2099_s16, %s2094_s10 }
  0x93   : > { %p2097_p4 = pnand %p2095_p0, %p2869_p8  ;;  %p2103_p2 = scmp.lt.u32.totalorder %s2094_s10, %s2545_s29 }
  0x94   : > { %p2102_p7 = por %p2101_p13, %p2100_p9 }
  0x95   : > { %p2098_p11 = pneg %p2097_p4 }
  0x96   : > { %p2104_p3 = por %p2103_p2, %p2102_p7 }
  0x98   : > { %p2105_p5 = pnand %p2104_p3, %p2098_p11 }
  0x9a   : > { %2108 = shalt.err (!%p2105_p5)
}
  0x9b   : > { %s2109_s25 = scalar_lea.vmem %s2548_s27, 128  ;;  %s2272_s4 = smov [#allocation5]  }
  0x9c   : > { %p2110_p12 = scmp.ne.s32.totalorder %s2548_s27, %s2109_s25  ;;  %s2114_s24 = sshll.u32 %s2272_s4, 4  ;;  %s2115_s24 = int_to_ptr.vmem [resolvable:$false] %s2114_s24 }
  0x9d   : > { %s2116_s30 = scalar_lea.vmem %s2115_s24, 256  ;;  %p2117_p10 = scmp.lt.s32.totalorder %s2548_s27, %s2115_s24 }
  0x9e   : > { %p2112_p1 = pnand %p2110_p12, %p2869_p8  ;;  %p2118_p0 = scmp.lt.s32.totalorder %s2116_s30, %s2109_s25 }
  0xa0   : > { %p2113_p6 = pneg %p2112_p1  ;;  %p2119_p4 = por %p2118_p0, %p2117_p10 }
  0xa2   : > { %p2120_p9 = pnand %p2119_p4, %p2113_p6 }
  0xa4   : > { %2123 = shalt.err (!%p2120_p9)
}
  0xa5   : > { %p2870_p11 = scmp.ne.s32.totalorder %s2861_s23, 0  ;;  %s399_s26 = scalar_lea.vmem [#allocation10], %s2453_s13 }
  0xa6   : > { %s406_s20 = sshll.u32 %s399_s26, 4  ;;  %s2124_s10 = scalar_lea.hbm %s2554_s9, 128  ;;  %s407_s20 = int_to_ptr.vmem [resolvable:$true] %s406_s20 }
  0xa7   : > { %1895 = dma.hbm_to_vmem [thread:$0]  (!%p2870_p11), %s2545_s29, 128, %s2548_s27, %s360_s1  }
  0xa8   : > { %p2125_p13 = scmp.ne.s32.totalorder %s2554_s9, %s2124_s10  ;;  %s2129_s16 = scalar_lea.hbm %s2807_s2, 256 }
  0xa9   : > { %p2130_p3 = scmp.lt.u32.totalorder %s2554_s9, %s2807_s2  ;;  %p2131_p5 = scmp.lt.u32.totalorder %s2129_s16, %s2124_s10 }
  0xaa   : > { %p2127_p7 = pnand %p2125_p13, %p2869_p8  ;;  %p2133_p1 = scmp.lt.u32.totalorder %s2124_s10, %s2554_s9 }
  0xab   : > { %p2132_p12 = por %p2131_p5, %p2130_p3 }
  0xac   : > { %p2128_p2 = pneg %p2127_p7 }
  0xad   : > { %p2134_p6 = por %p2133_p1, %p2132_p12 }
  0xaf   : > { %p2135_p10 = pnand %p2134_p6, %p2128_p2 }
  0xb1   : > { %2138 = shalt.err (!%p2135_p10)
}
  0xb2   : > { %s2139_s13 = scalar_lea.vmem %s407_s20, 128  ;;  %s2273_s29 = smov [#allocation10]  }
  0xb3   : > { %p2140_p0 = scmp.ne.s32.totalorder %s407_s20, %s2139_s13  ;;  %s2144_s27 = sshll.u32 %s2273_s29, 4  ;;  %s2145_s27 = int_to_ptr.vmem [resolvable:$false] %s2144_s27 }
  0xb4   : > { %s2146_s1 = scalar_lea.vmem %s2145_s27, 256  ;;  %p2147_p13 = scmp.lt.s32.totalorder %s407_s20, %s2145_s27 }
  0xb5   : > { %p2142_p4 = pnand %p2140_p0, %p2869_p8  ;;  %p2148_p7 = scmp.lt.s32.totalorder %s2146_s1, %s2139_s13 }
  0xb7   : > { %p2143_p9 = pneg %p2142_p4  ;;  %p2149_p11 = por %p2148_p7, %p2147_p13 }
  0xb9   : > { %p2150_p3 = pnand %p2149_p11, %p2143_p9 }
  0xbb   : > { %2153 = shalt.err (!%p2150_p3)
}
  0xbc   : > { %p2871_p5 = scmp.ne.s32.totalorder %s2861_s23, 0  ;;  %p2872_p2 = scmp.ne.s32.totalorder %s2852_s21, 0 }
  0xbd   : > { %s2601_s12 = sand.u32 (!%p2872_p2), 1, %s2256_s14   ;;  %p2873_p8 = scmp.ne.s32.totalorder (!%p2872_p2), %s2849_s19, 0 }
  0xbe   : > { %1901 = dma.hbm_to_vmem [thread:$0]  (!%p2871_p5), %s2554_s9, 128, %s407_s20, %s2469_s28  }
  0xbf   : > { %421 = sbr.rel (%p2872_p2) target bundleno = 1300 (0x514), region = 56  ;;  %s2604_s25 = sshll.u32 (!%p2872_p2), %s2601_s12, 3 }
  0xc0   : > { %s424_s4 = scalar_lea.sflag (!%p2872_p2), [#allocation6], %s2601_s12  ;;  %s427_s24 = scalar_lea.vmem (!%p2872_p2), [#allocation5], %s2604_s25 }
  0xc6   : > { %2227 = dma.done.wait (%p2873_p8), %s424_s4, 128  }
  0xc7   : > { %2229 = vsyncadd (%p2873_p8), %s424_s4, 4294967168  ;;  %s432_s21 = sand.u32 1, %s2362_s17   ;;  %s436_s23 = scalar_lea.vmem [#allocation8], %s2604_s25 }
  0xc8   : > { %s433_s28 = scalar_lea.sflag [#allocation9], %s432_s21 }
  0xc9   : > { %2231 = dma.done.wait (%p2873_p8), %s433_s28, 256  }
  0xca   : > { %2233 = vsyncadd (%p2873_p8), %s433_s28, 4294967040  ;;  %s445_s9 = scalar_lea.vmem [#allocation10], %s2604_s25  ;;  %p2874_p11 = scmp.eq.s32.totalorder %s2362_s17, 0 }
  0xcc   : > { %2235 = dma.done.wait (%p2874_p11), [#allocation12], 1024   ;;  %p2875_p12 = pmov %p2874_p11 }
  0xcd   : > { %p2876_p1 = pmov %p2874_p11 }
  0xce   : > { %2237 = vsyncadd (%p2875_p12), [#allocation12], 4294966272 }
  0xcf   : > { %2239 = dma.done.wait (%p2876_p1), [#allocation15], 512   ;;  %p2877_p6 = pmov %p2876_p1 }
  0xd0   : > { %v2274_v0 = vmov 0.0|0.0   ;;  %vm2275_vm0 = vmmov 0   ;;  %v2276_v1 = vmov 0.0   ;;  %v518_v2 = vld [vmem:[#allocation11] sm:$0xff]  ;;  %v519_v3 = vld [vmem:[#allocation11 + $0x8] sm:$0xff]  ;;  %v520_v7 = vld [vmem:[#allocation11 + $0x10] sm:$0xff] }
  0xd1   : > { %2241 = vsyncadd (%p2877_p6), [#allocation15], 4294966784  ;;  %1842 = vmatprep.subr.bf16.mxu0 %v2274_v0  ;;  %1848 = vmatprep.subr.bf16.mxu1 %v2274_v0  ;;  %v603_v4 = vld [vmem:[#allocation13] sm:$0xff]  ;;  %v1843_v5 = vpack.c.bf16 %v519_v3, %v518_v2  ;;  %v604_v6 = vld [vmem:[#allocation13 + $0x8] sm:$0xff]  ;;  %vm529_vm1 = vcmask 261120   ;;  %vm772_vm2 = vcmask 64512  }
  0xd2   : > { %1777 = vmatprep.mubr.msk.f32.mxu0 %vm2275_vm0, %v2276_v1  ;;  %1788 = vmatprep.mubr.msk.f32.mxu1 %vm2275_vm0, %v2276_v1  ;;  %v521_v8 = vld [vmem:[#allocation11 + $0x18] sm:$0xff]  ;;  %v1849_v9 = vpack.c.bf16 %v604_v6, %v603_v4  ;;  %v605_v10 = vld [vmem:[#allocation13 + $0x10] sm:$0xff]  ;;  %v516_v15 = vld [vmem:[%s436_s23] sm:$0xff]  ;;  %s2277_s26 = smov 112   ;;  %s2278_s20 = smov 120  }
  0xd3   : > { %v606_v11 = vld [vmem:[#allocation13 + $0x18] sm:$0xff]  ;;  %1844 = vmatpush3.bf16.msra.mxu0 %v1843_v5  ;;  %v1846_v12 = vpack.c.bf16 %v521_v8, %v520_v7  ;;  %v680_v16 = vld [vmem:[#allocation14] sm:$0xff]  ;;  %v681_v17 = vld [vmem:[#allocation14 + $0x8] sm:$0xff]  ;;  %s2279_s10 = smov 104   ;;  %p512_p10 = scmp.lt.s32.totalorder %s2362_s17, 1 }
  0xd4   : > { %1850 = vmatpush3.bf16.msra.mxu1 %v1849_v9  ;;  %1845 = vmatprep.subr.bf16.mxu0 %v2274_v0  ;;  %v1852_v13 = vpack.c.bf16 %v606_v11, %v605_v10  ;;  %v515_v14 = vld [vmem:[%s427_s24] sm:$0xff]  ;;  %v1855_v19 = vpack.c.bf16 %v681_v17, %v680_v16  ;;  %s2878_s13 = sld [smem:[#allocation32_spill]]  ;;  %s1708_s27 = sshll.u32 %s2601_s12, 5 }
  0xd5   : > { %1851 = vmatprep.subr.bf16.mxu1 %v2274_v0  ;;  %v682_v18 = vld [vmem:[#allocation14 + $0x10] sm:$0xff]  ;;  %v683_v20 = vld [vmem:[#allocation14 + $0x18] sm:$0xff]  ;;  %s513_s16 = scalar_select %p512_p10, %s2362_s17, 1 }
  0xd6   : > { %v1858_v21 = vpack.c.bf16 %v683_v20, %v682_v18  ;;  %v517_v22 = vld [vmem:[%s445_s9] sm:$0xff]  ;;  %s2692_s1 = scalar_lea.vmem [#allocation17], %s1708_s27  ;;  %s2879_s4 = sld [smem:[#allocation30_spill]] }
  0xd7   : > { %1847 = vmatpush3.bf16.msra.mxu0 %v1846_v12  ;;  %v1709_v23 = vld [vmem:[%s2810_s5] ss:$0 sm:$0xff]  ;;  %s2714_s24 = scalar_lea.vmem [#allocation16], %s2604_s25  ;;  %s1737_s21 = sshll.u32 %s2362_s17, 9 }
  0xd8   : > { %1853 = vmatpush3.bf16.msra.mxu1 %v1852_v13  ;;  %1854 = vmatprep.subr.bf16.mxu0 %v2274_v0  ;;  %v1712_v32 = vld [vmem:[%s2813_s8] ss:$0 sm:$0xff]  ;;  %s1502_s28 = sshll.u32 %s2692_s1, 4  ;;  %s2880_s19 = sld [smem:[#allocation35_spill]]  ;;  %s2725_s28 = int_to_ptr.vmem [resolvable:$true] %s1502_s28 }
  0xd9   : > { %1802 = vmatprep.subr.mxu1 %v2276_v1  ;;  %s1476_s25 = scalar_lea.sflag [#allocation18], %s2601_s12 }
  0xda   : > { %1778 = vmatmul.mubr.msk.f32.vlgmr.msra.gmra.mrb[0].mxu0 %vm529_vm1, %v515_v14  ;;  %s514_s29 = scalar_lea.vmem %s2878_s13, %s513_s16 }
  0xdb   : > { %1789 = vmatmul.mubr.msk.f32.vlgmr.msra.gmra.mrb[0].mxu1 %vm529_vm1, %v516_v15  ;;  %1799 = vmatprep.mubr.msk.f32.mxu0 %vm2275_vm0, %v2276_v1  ;;  %v1716_v46 = vld [vmem:[%s514_s29] ss:$0 sm:$0xff] }
  0xdc   : > { %1804 = vmatprep.mubr.msk.f32.mxu1 %vm2275_vm0, %v2276_v1  ;;  %1856 = vmatpush3.bf16.msra.mxu0 %v1855_v19  ;;  %p2881_p4 = scmp.ne.s32.totalorder %s2879_s4, 0 }
  0xdd   : > { %1857 = vmatprep.subr.bf16.mxu0 %v2274_v0 }
  0xde   : > { %s2723_s30 = scalar_lea.hbm %s2880_s19, %s1737_s21 }
  0xe0   : > { %1859 = vmatpush3.bf16.msra.mxu0 %v1858_v21 }
  0xe1   : > { %1812 = vmatprep.subr.mxu0 %v2276_v1 }
  0xe3   : > { %1800 = vmatmul.mubr.msk.f32.vlgmr.msra.gmra.mrb[2].mxu0 %vm529_vm1, %v517_v22 }
  0xe4   : > { %1814 = vmatprep.mubr.msk.f32.mxu0 %vm2275_vm0, %v2276_v1 }
 0x1ad   : > { %v599_v24 = vpop.f32.mrb[0].mxu0 }
 0x1ae   : > { %v600_v25 = vadd.f32 %v1709_v23, %v599_v24  ;;  %v676_v26 = vpop.f32.mrb[0].mxu1  ;;  %v1779_v27 = vpop.f32.mrb[1].mxu0 }
 0x1af   : > { %766 = vst.msk [vmem:[#allocation3] sm:$0xff] %vm529_vm1, %v676_v26  ;;  %v1790_v28 = vpop.f32.mrb[1].mxu1 }
 0x1b0   : > { %v764_v29 = vmul.f32 0.35355338, %v600_v25 }
 0x1b2   : > { %765 = vst.msk [vmem:[#allocation2] sm:$0xff] %vm529_vm1, %v764_v29 }
 0x1b6   : > { %v1117_v30 = vld [vmem:[#allocation3] sm:$0xff]  ;;  %v760_v33 = vpop.f32.mrb[2].mxu0 }
 0x1b7   : > { %1123 = vrot.lane.b32.xlu1 %v1117_v30, %s2277_s26  ;;  %946 = vrot.lane.b32.xlu0 %v1117_v30, %s2278_s20  ;;  %v761_v34 = vadd.f32 %v1712_v32, %v760_v33  ;;  %v1801_v35 = vpop.f32.mrb[3].mxu0 }
 0x1b8   : > { %1803 = vmatpush3.xpose.msk.msra.mxu1 %vm772_vm2, %v1117_v30 }
 0x1b9   : > { %v1116_v31 = vld [vmem:[#allocation2] sm:$0xff]  ;;  %1807 = vmatprep.subr.mxu1 %v2276_v1  ;;  %767 = vst.msk [vmem:[#allocation4] sm:$0xff] %vm529_vm1, %v761_v34 }
 0x1bb   : > { %1120 = vrot.lane.b32.xlu1 %v1116_v31, %s2277_s26  ;;  %943 = vrot.lane.b32.xlu0 %v1116_v31, %s2278_s20 }
 0x1bc   : > { %1805 = vmatmul.mubr.msk.f32.vlgmr.msra.gmra.mrb[2].mxu1 %vm772_vm2, %v1116_v31 }
 0x1bd   : > { %1809 = vmatprep.mubr.msk.f32.mxu1 %vm2275_vm0, %v2276_v1 }
 0x1bf   : > { %1297 = vrot.lane.b32.xlu1 %v1116_v31, %s2279_s10  ;;  %1300 = vrot.lane.b32.xlu0 %v1117_v30, %s2279_s10 }
 0x1c0   : > { %v941_v38 = vld [vmem:[#allocation4] sm:$0xff] }
 0x1c1   : > { %1808 = vmatpush3.msra.mxu1 %v941_v38 }
 0x1c2   : > { %1817 = vmatprep.subr.mxu1 %v2276_v1 }
 0x1c3   : > { %1032 = vrot.lane.b32.xlu1 %v941_v38, %s2278_s20  ;;  %s2154_s20 = scalar_lea.vmem %s2725_s28, 512 }
 0x1c4   : > { %p2155_p0 = scmp.ne.s32.totalorder %s2725_s28, %s2154_s20 }
 0x1c6   : > { %p2156_p9 = pnand %p2155_p0, %p2881_p4 }
 0x1c8   : > { %p2157_p13 = pneg %p2156_p9 }
 0x229   : > { %v1124_v36 = vpop.permute.xlu1 %1123  ;;  %v947_v37 = vpop.permute.xlu0 %946 }
 0x22a   : > { %1813 = vmatpush3.xpose.msk.msra.mxu0 %vm772_vm2, %v947_v37 }
 0x22b   : > { %1822 = vmatprep.subr.mxu0 %v2276_v1 }
 0x22d   : > { %v944_v39 = vpop.permute.xlu0 %943  ;;  %v1121_v40 = vpop.permute.xlu1 %1120 }
 0x22e   : > { %1815 = vmatmul.mubr.msk.f32.vlgmr.msra.gmra.mrb[4].mxu0 %vm772_vm2, %v944_v39 }
 0x22f   : > { %1823 = vmatpush3.xpose.msk.msra.mxu0 %vm772_vm2, %v1124_v36  ;;  %1824 = vmatprep.mubr.msk.f32.mxu0 %vm2275_vm0, %v2276_v1 }
 0x230   : > { %1832 = vmatprep.subr.mxu0 %v2276_v1 }
 0x231   : > { %v1301_v41 = vpop.permute.xlu0 %1300  ;;  %v1298_v42 = vpop.permute.xlu1 %1297 }
 0x232   : > { %1825 = vmatmul.mubr.msk.f32.vlgmr.msra.gmra.mrb[6].mxu0 %vm772_vm2, %v1121_v40 }
 0x233   : > { %1833 = vmatpush3.xpose.msk.msra.mxu0 %vm772_vm2, %v1301_v41  ;;  %1834 = vmatprep.mubr.msk.f32.mxu0 %vm2275_vm0, %v2276_v1 }
 0x235   : > { %v1033_v9 = vpop.permute.xlu1 %1032 }
 0x236   : > { %1835 = vmatmul.mubr.msk.f32.vlgmr.msra.gmra.mrb[8].mxu0 %vm772_vm2, %v1298_v42 }
 0x28f   : > { %v845_v43 = vpop.f32.mrb[2].mxu1 }
 0x290   : > { %v849_v44 = vmul.f32 1.442695, %v845_v43  ;;  %v1806_v45 = vpop.f32.mrb[3].mxu1 }
 0x292   : > { %1964 = vpow2.f32 %v849_v44 }
 0x29c   : > { %v1965_v47 = vpop.eup %1964 }
 0x29d   : > { %v857_v48 = vmul.f32 %v1965_v47, %v1716_v46 }
 0x29f   : > { %v858_v49 = vsel %vm772_vm2, %v857_v48, 0.0 }
 0x2a0   : > { %859 = vadd.xlane.f32.xlu0 %v858_v49 }
 0x301   : > { %v1018_v50 = vpop.f32.mrb[4].mxu0 }
 0x302   : > { %v1022_v51 = vmul.f32 1.442695, %v1018_v50  ;;  %v1816_v52 = vpop.f32.mrb[5].mxu0 }
 0x304   : > { %1966 = vpow2.f32 %v1022_v51 }
 0x305   : > { %v1195_v53 = vpop.f32.mrb[6].mxu0 }
 0x306   : > { %v1199_v54 = vmul.f32 1.442695, %v1195_v53  ;;  %v1826_v55 = vpop.f32.mrb[7].mxu0 }
 0x308   : > { %1968 = vpow2.f32 %v1199_v54 }
 0x309   : > { %v1372_v56 = vpop.f32.mrb[8].mxu0 }
 0x30a   : > { %v1376_v57 = vmul.f32 1.442695, %v1372_v56  ;;  %v1836_v58 = vpop.f32.mrb[9].mxu0 }
 0x30c   : > { %1970 = vpow2.f32 %v1376_v57 }
 0x30e   : > { %v1967_v59 = vpop.eup %1966 }
 0x30f   : > { %v1024_v60 = vmul.f32 %v1967_v59, %v1716_v46 }
 0x311   : > { %v1025_v61 = vsel %vm772_vm2, %v1024_v60, 0.0 }
 0x312   : > { %v1969_v62 = vpop.eup %1968  ;;  %1026 = vadd.xlane.f32.xlu1 %v1025_v61 }
 0x313   : > { %v1201_v63 = vmul.f32 %v1969_v62, %v1716_v46 }
 0x315   : > { %v1202_v0 = vsel %vm772_vm2, %v1201_v63, 0.0 }
 0x316   : > { %v1971_v2 = vpop.eup %1970  ;;  %1203 = vadd.xlane.f32.xlu0 %v1202_v0 }
 0x317   : > { %v1378_v3 = vmul.f32 %v1971_v2, %v1716_v46 }
 0x319   : > { %v1379_v4 = vsel %vm772_vm2, %v1378_v3, 0.0 }
 0x31a   : > { %1380 = vadd.xlane.f32.xlu0 %v1379_v4 }
 0x323   : > { %1386 = vrot.lane.b32.xlu1 %v941_v38, %s2279_s10  ;;  %s2281_s10 = smov [#allocation17]  }
 0x324   : > { %s2158_s11 = sshll.u32 %s2281_s10, 4  ;;  %s2159_s11 = int_to_ptr.vmem [resolvable:$false] %s2158_s11 }
 0x325   : > { %s2160_s3 = scalar_lea.vmem %s2159_s11, 1024  ;;  %p2161_p7 = scmp.lt.s32.totalorder %s2725_s28, %s2159_s11 }
 0x326   : > { %p2162_p3 = scmp.lt.s32.totalorder %s2160_s3, %s2154_s20 }
 0x328   : > { %p2163_p5 = por %p2162_p3, %p2161_p7 }
 0x32a   : > { %p2164_p2 = pnand %p2163_p5, %p2157_p13 }
 0x32d   : > { %v860_v5 = vpop.xlane.xlu0 %859 }
 0x32e   : > { %v861_v6 = vadd.f32 1e-08, %v860_v5 }
 0x330   : > { %1972 = vrcp.f32 %v861_v6  ;;  %1209 = vrot.lane.b32.xlu0 %v941_v38, %s2277_s26  ;;  %s2280_s26 = smov 8  }
 0x33a   : > { %v1973_v7 = vpop.eup %1972 }
 0x33b   : > { %v863_v8 = vmul.f32 %v1973_v7, %v857_v48 }
 0x33d   : > { %1810 = vmatmul.mubr.msk.f32.vlgmr.msra.gmra.mrb[4].mxu1 %vm772_vm2, %v863_v8  ;;  %938 = vst.msk [vmem:[%s2692_s1] sm:$0xff] %vm772_vm2, %v863_v8 }
 0x33e   : > { %1818 = vmatpush3.msra.mxu1 %v1033_v9  ;;  %1819 = vmatprep.mubr.msk.f32.mxu1 %vm2275_vm0, %v2276_v1 }
 0x33f   : > { %1827 = vmatprep.subr.mxu1 %v2276_v1 }
 0x39f   : > { %v1027_v10 = vpop.xlane.xlu1 %1026 }
 0x3a0   : > { %v1028_v11 = vadd.f32 1e-08, %v1027_v10 }
 0x3a2   : > { %1974 = vrcp.f32 %v1028_v11 }
 0x3a3   : > { %v1204_v12 = vpop.xlane.xlu0 %1203  ;;  %v1387_v21 = vpop.permute.xlu1 %1386 }
 0x3a4   : > { %v1205_v13 = vadd.f32 1e-08, %v1204_v12 }
 0x3a6   : > { %1976 = vrcp.f32 %v1205_v13 }
 0x3a7   : > { %v1381_v14 = vpop.xlane.xlu0 %1380 }
 0x3a8   : > { %v1382_v15 = vadd.f32 1e-08, %v1381_v14 }
 0x3aa   : > { %1978 = vrcp.f32 %v1382_v15 }
 0x3ab   : > { %v1210_v18 = vpop.permute.xlu0 %1209 }
 0x3ac   : > { %v1975_v16 = vpop.eup %1974 }
 0x3ad   : > { %v1030_v17 = vmul.f32 %v1975_v16, %v1024_v60 }
 0x3af   : > { %1820 = vmatmul.mubr.msk.f32.vlgmr.msra.gmra.mrb[6].mxu1 %vm772_vm2, %v1030_v17  ;;  %1721 = vst.msk [vmem:[%s2692_s1 + $0x8] sm:$0xff] %vm772_vm2, %v1030_v17 }
 0x3b0   : > { %v1977_v19 = vpop.eup %1976  ;;  %1828 = vmatpush3.msra.mxu1 %v1210_v18  ;;  %1829 = vmatprep.mubr.msk.f32.mxu1 %vm2275_vm0, %v2276_v1 }
 0x3b1   : > { %1837 = vmatprep.subr.mxu1 %v2276_v1  ;;  %v1207_v20 = vmul.f32 %v1977_v19, %v1201_v63 }
 0x3b3   : > { %1830 = vmatmul.mubr.msk.f32.vlgmr.msra.gmra.mrb[8].mxu1 %vm772_vm2, %v1207_v20  ;;  %1725 = vst.msk [vmem:[%s2692_s1 + $0x10] sm:$0xff] %vm772_vm2, %v1207_v20 }
 0x3b4   : > { %v1979_v22 = vpop.eup %1978  ;;  %1838 = vmatpush3.msra.mxu1 %v1387_v21  ;;  %1839 = vmatprep.mubr.msk.f32.mxu1 %vm2275_vm0, %v2276_v1 }
 0x3b5   : > { %v1384_v23 = vmul.f32 %v1979_v22, %v1378_v3 }
 0x3b7   : > { %1840 = vmatmul.mubr.msk.f32.vlgmr.msra.gmra.mrb[10].mxu1 %vm772_vm2, %v1384_v23  ;;  %1729 = vst.msk [vmem:[%s2692_s1 + $0x18] sm:$0xff] %vm772_vm2, %v1384_v23 }
 0x410   : > { %v933_v24 = vpop.f32.mrb[4].mxu1 }
 0x411   : > { %937 = vst.msk [vmem:[%s2714_s24] sm:$0xff] %vm772_vm2, %v933_v24  ;;  %v1811_v25 = vpop.f32.mrb[5].mxu1 }
 0x482   : > { %v1104_v26 = vpop.f32.mrb[6].mxu1 }
 0x483   : > { %1109 = vrot.lane.b32.xlu1 %v1104_v26, %s2280_s26  ;;  %v1821_v1 = vpop.f32.mrb[7].mxu1 }
 0x484   : > { %2167 = shalt.err (!%p2164_p2)
}
 0x485   : > { %s2168_s16 = scalar_lea.hbm %s2723_s30, 512  ;;  %s2172_s13 = scalar_lea.hbm %s2880_s19, 1024 }
 0x486   : > { %p2169_p8 = scmp.ne.s32.totalorder %s2723_s30, %s2168_s16  ;;  %p2173_p1 = scmp.lt.u32.totalorder %s2723_s30, %s2880_s19 }
 0x487   : > { %p2174_p6 = scmp.lt.u32.totalorder %s2172_s13, %s2168_s16  ;;  %p2176_p0 = scmp.lt.u32.totalorder %s2168_s16, %s2723_s30 }
 0x488   : > { %p2170_p11 = pnand %p2169_p8, %p2881_p4 }
 0x489   : > { %p2175_p10 = por %p2174_p6, %p2173_p1 }
 0x48a   : > { %p2171_p12 = pneg %p2170_p11 }
 0x48b   : > { %p2177_p9 = por %p2176_p0, %p2175_p10 }
 0x48d   : > { %p2178_p13 = pnand %p2177_p9, %p2171_p12 }
 0x48f   : > { %2181 = shalt.err (!%p2178_p13)
}
 0x490   : > { %s2282_s1 = smov 128   ;;  %v1281_v27 = vpop.f32.mrb[8].mxu1  ;;  %s2283_s21 = smov 16   ;;  %vm1112_vm3 = vcmask 130112   ;;  %vm1289_vm4 = vcmask 195712   ;;  %vm1466_vm5 = vcmask 261312  }
 0x491   : > { %1879 = dma.vmem_to_hbm [thread:$0]  (%p2881_p4), %s2725_s28, 512, %s2723_s30, %s1476_s25, %s2282_s1, %s2282_s1, %s2280_s26   ;;  %v1831_v28 = vpop.f32.mrb[9].mxu1 }
 0x492   : > { %1286 = vrot.lane.b32.xlu0 %v1281_v27, %s2283_s21  ;;  %v1458_v29 = vpop.f32.mrb[10].mxu1  ;;  %s2284_s23 = smov 24   ;;  %s1732_s9 = sshll.u32 %s2362_s17, 7 }
 0x493   : > { %1463 = vrot.lane.b32.xlu1 %v1458_v29, %s2284_s23  ;;  %v1841_v30 = vpop.f32.mrb[11].mxu1  ;;  %s1489_s20 = sshll.u32 %s2714_s24, 4  ;;  %s2882_s26 = sld [smem:[#allocation34_spill]]  ;;  %s2762_s20 = int_to_ptr.vmem [resolvable:$true] %s1489_s20 }
 0x494   : > { %s1471_s10 = scalar_lea.sflag [#allocation7], %s2601_s12  ;;  %s2182_s11 = scalar_lea.vmem %s2762_s20, 128 }
 0x495   : > { %p2183_p7 = scmp.ne.s32.totalorder %s2762_s20, %s2182_s11  ;;  %s2285_s17 = smov [#allocation16]  }
 0x496   : > { %s2186_s3 = sshll.u32 %s2285_s17, 4  ;;  %s2187_s3 = int_to_ptr.vmem [resolvable:$false] %s2186_s3 }
 0x497   : > { %p2184_p3 = pnand %p2183_p7, %p2881_p4  ;;  %s2188_s16 = scalar_lea.vmem %s2187_s3, 256 }
 0x498   : > { %p2189_p2 = scmp.lt.s32.totalorder %s2762_s20, %s2187_s3  ;;  %p2190_p8 = scmp.lt.s32.totalorder %s2188_s16, %s2182_s11 }
 0x499   : > { %s2760_s25 = scalar_lea.hbm %s2882_s26, %s1732_s9  ;;  %p2185_p5 = pneg %p2184_p3 }
 0x49a   : > { %p2191_p11 = por %p2190_p8, %p2189_p2 }
 0x49c   : > { %p2192_p12 = pnand %p2191_p11, %p2185_p5 }
 0x4f5   : > { %v1110_v31 = vpop.permute.xlu1 %1109 }
 0x4f6   : > { %1113 = vst.msk [vmem:[%s2714_s24] sm:$0xff] %vm1112_vm3, %v1110_v31 }
 0x504   : > { %v1287_v32 = vpop.permute.xlu0 %1286 }
 0x505   : > { %1290 = vst.msk [vmem:[%s2714_s24] sm:$0xff] %vm1289_vm4, %v1287_v32  ;;  %v1464_v33 = vpop.permute.xlu1 %1463 }
 0x506   : > { %1467 = vst.msk [vmem:[%s2714_s24] sm:$0xff] %vm1466_vm5, %v1464_v33 }
 0x507   : > { %2195 = shalt.err (!%p2192_p12)
}
 0x508   : > { %s2196_s12 = scalar_lea.hbm %s2760_s25, 128  ;;  %s2200_s18 = scalar_lea.hbm %s2882_s26, 256 }
 0x509   : > { %p2197_p1 = scmp.ne.s32.totalorder %s2760_s25, %s2196_s12  ;;  %p2201_p0 = scmp.lt.u32.totalorder %s2760_s25, %s2882_s26 }
 0x50a   : > { %p2202_p9 = scmp.lt.u32.totalorder %s2200_s18, %s2196_s12  ;;  %p2204_p7 = scmp.lt.u32.totalorder %s2196_s12, %s2760_s25 }
 0x50b   : > { %p2198_p6 = pnand %p2197_p1, %p2881_p4 }
 0x50c   : > { %p2203_p13 = por %p2202_p9, %p2201_p0 }
 0x50d   : > { %p2199_p10 = pneg %p2198_p6 }
 0x50e   : > { %p2205_p3 = por %p2204_p7, %p2203_p13 }
 0x510   : > { %p2206_p5 = pnand %p2205_p3, %p2199_p10 }
 0x512   : > { %2209 = shalt.err (!%p2206_p5)
}
 0x513   : > { %1878 = dma.vmem_to_hbm [thread:$0]  (%p2881_p4), %s2762_s20, 128, %s2760_s25, %s1471_s10  }
 0x514 PF: > { %s2883_s27 = sld [smem:[#allocation25_spill]]  ;;  %s2884_s1 = sld [smem:[#allocation27_spill]] }
 0x515   : > { %s2885_s21 = sld [smem:[#allocation26_spill]] }
 0x51a   : > { %s1517_s23 = sand.u32 1, %s2883_s27   ;;  %p2886_p2 = scmp.ne.s32.totalorder %s2884_s1, 0 }
 0x51b   : > { %p2887_p8 = scmp.ge.s32.totalorder %s2885_s21, 2  ;;  %s1518_s9 = scalar_lea.sflag [#allocation7], %s1517_s23 }
 0x51d   : > { %p1903_p11 = pnand %p2887_p8, %p2886_p2 }
 0x51f   : > { %2243 = dma.done.wait (!%p1903_p11), %s1518_s9, 128  }
 0x520   : > { %2245 = vsyncadd (!%p1903_p11), %s1518_s9, 4294967168  ;;  %s1527_s28 = scalar_lea.sflag [#allocation18], %s1517_s23 }
 0x521   : > { %2247 = dma.done.wait (!%p1903_p11), %s1527_s28, 512  }
 0x522   : > { %2249 = vsyncadd (!%p1903_p11), %s1527_s28, 4294966784  ;;  %s2888_s16 = sld [smem:[#allocation28_spill]]  ;;  %s2889_s4 = sld [smem:[#allocation29_spill]] }
 0x523   : > { %s2890_s13 = smov %s2256_s14  ;;  %s2891_s14 = smov %s2260_s15 }
 0x528   : > { %p32_p4 = scmp.ge.s32.totalorder %s2888_s16, 4   ;;  %s2892_s15 = smov %s2889_s4 }
 0x52a   :  { %34 = sbr.rel (!%p32_p4) target bundleno = 17 (0x11), region = 160 }
 0x531   :  { %1532 = vsyncpa [#allocation6], 1 }
 0x532   :  { %1534 = vsyncpa [#allocation6 + $0x1], 1 }
 0x533   :  { %1535 = vsyncpa [#allocation9], 1 }
 0x534   :  { %1537 = vsyncpa [#allocation9 + $0x1], 1 }
 0x535   :  { %1538 = vsyncpa [#allocation12], 1 }
 0x536   :  { %1539 = vsyncpa [#allocation15], 1 }
 0x537   :  { %1540 = vsyncpa [#allocation7], 1 }
 0x538   :  { %1542 = vsyncpa [#allocation7 + $0x1], 1 }
 0x539   :  { %1543 = vsyncpa [#allocation18], 1 }
 0x53a   :  { %1545 = vsyncpa [#allocation18 + $0x1], 1 }

</bundles_post_ra>
